<compile_context>
chip_gen: v7x
topology: tpu7x:2x2x1
jax: 0.10.0
libtpu: 0.0.40
codegen_flags: <defaults>
</compile_context>

<pallas_src>
import jax
import jax.numpy as jnp
import numpy as np
from jax.experimental import pallas as pl
from jax.experimental.pallas import tpu as pltpu

EPS = 1e-5


def _conv3_fused(x, w_cat):
    """Conv1d(kernel=3, stride=1, padding=1, no bias) as one MXU matmul.

    x:     (C_in, L)       activation tile, native dtype (f32 or bf16).
    w_cat: (C_out, 3*C_in) taps concatenated tap-major along the contraction
                           axis (k=0,1,2 -> input offsets l-1, l, l+1).
    returns (C_out, L) float32.
    """
    C, L = x.shape
    lane = jax.lax.broadcasted_iota(jnp.int32, (C, L), 1)
    zero = jnp.zeros((), x.dtype)
    # Lane shifts via XLU rotate (idle slot here) + edge masks; rotating by
    # L-1 is the "+1" shift without relying on negative shift values.
    x_m1 = jnp.where(lane == 0, zero, pltpu.roll(x, shift=1, axis=1))         # x[:, l-1]
    x_p1 = jnp.where(lane == L - 1, zero, pltpu.roll(x, shift=L - 1, axis=1))  # x[:, l+1]
    x_stack = jnp.concatenate([x_m1, x, x_p1], axis=0)                        # (3*C_in, L)
    return jnp.dot(w_cat, x_stack, preferred_element_type=jnp.float32)


def _instance_norm(y, gamma, beta):
    """Per-sample, per-channel norm over L. Single-pass stats, biased variance.

    y: (C, L) f32; gamma/beta: (C, 1) f32.
    Affine folded into scale/shift -> per-element work is a single FMA.
    """
    L = y.shape[1]
    inv_l = jnp.float32(1.0 / L)
    s = jnp.sum(y, axis=1, keepdims=True)
    ss = jnp.sum(y * y, axis=1, keepdims=True)
    mean = s * inv_l
    var = jnp.maximum(ss * inv_l - mean * mean, 0.0)      # biased variance
    scale = gamma * jax.lax.rsqrt(var + EPS)              # rsqrt -> EUP slot
    shift = beta - mean * scale
    return y * scale + shift


def residual_block_kernel(x_ref, w1_ref, g1_ref, b1_ref,
                          w2_ref, g2_ref, b2_ref, o_ref):
    x = x_ref[0]                                       # (C, L), native dtype for MXU
    h = _conv3_fused(x, w1_ref[...])                   # conv1 -> f32
    h = _instance_norm(h, g1_ref[...], b1_ref[...])
    h = jnp.maximum(h, 0.0)                            # ReLU
    h = _conv3_fused(h.astype(x.dtype), w2_ref[...])   # conv2 (bf16 MXU path if bf16 in)
    h = _instance_norm(h, g2_ref[...], b2_ref[...])
    o_ref[0] = (x.astype(jnp.float32) + h).astype(o_ref.dtype)   # residual add


def residual_block(x, w1, g1, b1, w2, g2, b2):
    """x: (N, C, L). w1/w2: PyTorch Conv1d weights (C_out, C_in, 3).
    g*/b*: InstanceNorm affine params, shape (C,)."""
    N, C, L = x.shape

    # One-time parameter repack (in real use do this at parameter-load time):
    # (C_out, C_in, 3) -> (C_out, 3*C_in), tap-major along the contraction axis
    # so all 3 taps run as a single, deeper MXU matmul.
    def to_cat(w):
        return jnp.transpose(w, (0, 2, 1)).reshape(C, 3 * C).astype(x.dtype)

    w1c, w2c = to_cat(w1), to_cat(w2)
    g1c = g1.reshape(C, 1).astype(jnp.float32)
    b1c = b1.reshape(C, 1).astype(jnp.float32)
    g2c = g2.reshape(C, 1).astype(jnp.float32)
    b2c = b2.reshape(C, 1).astype(jnp.float32)

    act_spec = pl.BlockSpec((1, C, L), lambda n: (n, 0, 0))
    w_spec = pl.BlockSpec((C, 3 * C), lambda n: (0, 0))   # grid-invariant: no re-DMA
    v_spec = pl.BlockSpec((C, 1), lambda n: (0, 0))

    # TODO(synk): for large C*L, process several batch elements per grid step
    # (lane-dense output) and cap tile sizes for v7x's 64 MiB VMEM via
    # vmem_limit_bytes; unnecessary at these shapes.
    return pl.pallas_call(
        residual_block_kernel,
        out_shape=jax.ShapeDtypeStruct((N, C, L), x.dtype),
        grid_spec=pltpu.PrefetchScalarGridSpec(
            num_scalar_prefetch=0,
            grid=(N,),
            in_specs=[
                act_spec,                 # x
                w_spec, v_spec, v_spec,   # conv1 / in1
                w_spec, v_spec, v_spec,   # conv2 / in2
            ],
            out_specs=act_spec,
        ),
        compiler_params=pltpu.CompilerParams(
            dimension_semantics=("parallel",)),
    )(x, w1c, g1c, b1c, w2c, g2c, b2c)


def reference(x, w1, g1, b1, w2, g2, b2):
    """Pure-JAX reference (PyTorch layouts: w (C_out, C_in, 3), g/b (C,))."""
    def conv(h, w):
        L = h.shape[2]
        hp = jnp.pad(h, ((0, 0), (0, 0), (1, 1)))
        return sum(jnp.einsum('oc,ncl->nol', w[:, :, k], hp[:, :, k:k + L])
                   for k in range(3))

    def inorm(h, g, b):
        m = h.mean(axis=2, keepdims=True)
        v = ((h - m) ** 2).mean(axis=2, keepdims=True)
        return (h - m) / jnp.sqrt(v + EPS) * g[None, :, None] + b[None, :, None]

    h = inorm(conv(x, w1), g1, b1)
    h = jnp.maximum(h, 0.0)
    h = inorm(conv(h, w2), g2, b2)
    return x + h


if __name__ == "__main__":
    # Residual add requires dim_in == dim_out.
    N, C, L = 2, 4, 16
    key = jax.random.PRNGKey(0)
    kx, k1, k2, kg1, kb1, kg2, kb2 = jax.random.split(key, 7)

    x = jax.random.normal(kx, (N, C, L), jnp.float32)
    # Conv weights in PyTorch Conv1d layout (C_out, C_in, kernel=3).
    w1 = jax.random.normal(k1, (C, C, 3), jnp.float32) * 0.2
    w2 = jax.random.normal(k2, (C, C, 3), jnp.float32) * 0.2
    # InstanceNorm affine params (gamma around 1, beta around 0), shape (C,).
    g1 = 1.0 + 0.1 * jax.random.normal(kg1, (C,), jnp.float32)
    b1 = 0.1 * jax.random.normal(kb1, (C,), jnp.float32)
    g2 = 1.0 + 0.1 * jax.random.normal(kg2, (C,), jnp.float32)
    b2 = 0.1 * jax.random.normal(kb2, (C,), jnp.float32)

    out = jax.block_until_ready(residual_block(x, w1, g1, b1, w2, g2, b2))
    ref = jax.block_until_ready(reference(x, w1, g1, b1, w2, g2, b2))
    np.testing.assert_allclose(np.asarray(out), np.asarray(ref),
                               rtol=1e-4, atol=1e-4)
    print("KERNEL_OK")
</pallas_src>

<mosaic_0001>
module attributes {stable_mosaic.version = 11 : i64} {
  func.func @residual_block_kernel(%arg0: i32, %arg1: memref<1x4x16xf32, #tpu.memory_space<vmem>>, %arg2: memref<4x12xf32, #tpu.memory_space<vmem>>, %arg3: memref<4x1xf32, #tpu.memory_space<vmem>>, %arg4: memref<4x1xf32, #tpu.memory_space<vmem>>, %arg5: memref<4x12xf32, #tpu.memory_space<vmem>>, %arg6: memref<4x1xf32, #tpu.memory_space<vmem>>, %arg7: memref<4x1xf32, #tpu.memory_space<vmem>>, %arg8: memref<1x4x16xf32, #tpu.memory_space<vmem>>) attributes {dimension_semantics = [#tpu.dimension_semantics<parallel>], iteration_bounds = array<i64: 2>, scalar_prefetch = 0 : i64, scratch_operands = 0 : i64, tpu.core_type = #tpu.core_type<tc>, window_params = [{transform_indices = @transform_0, window_bounds = array<i64: 1, 4, 16>}, {pipeline_mode = #tpu.pipeline_mode<synchronous>, transform_indices = @transform_1, window_bounds = array<i64: 4, 12>}, {pipeline_mode = #tpu.pipeline_mode<synchronous>, transform_indices = @transform_2, window_bounds = array<i64: 4, 1>}, {pipeline_mode = #tpu.pipeline_mode<synchronous>, transform_indices = @transform_3, window_bounds = array<i64: 4, 1>}, {pipeline_mode = #tpu.pipeline_mode<synchronous>, transform_indices = @transform_4, window_bounds = array<i64: 4, 12>}, {pipeline_mode = #tpu.pipeline_mode<synchronous>, transform_indices = @transform_5, window_bounds = array<i64: 4, 1>}, {pipeline_mode = #tpu.pipeline_mode<synchronous>, transform_indices = @transform_6, window_bounds = array<i64: 4, 1>}, {transform_indices = @transform_7, window_bounds = array<i64: 1, 4, 16>}]} {
    %c0 = arith.constant 0 : index
    %c0_0 = arith.constant 0 : index
    %c0_1 = arith.constant 0 : index
    %0 = vector.load %arg1[%c0, %c0_0, %c0_1] : memref<1x4x16xf32, #tpu.memory_space<vmem>>, vector<1x4x16xf32>
    %1 = vector.shape_cast %0 : vector<1x4x16xf32> to vector<4x16xf32>
    %c0_2 = arith.constant 0 : index
    %c0_3 = arith.constant 0 : index
    %2 = vector.load %arg2[%c0_2, %c0_3] : memref<4x12xf32, #tpu.memory_space<vmem>>, vector<4x12xf32>
    %3 = tpu.iota {dimensions = array<i32: 1>} : vector<4x16xi32>
    %c0_i32 = arith.constant 0 : i32
    %4 = vector.broadcast %c0_i32 : i32 to vector<4x16xi32>
    %5 = arith.cmpi eq, %3, %4 : vector<4x16xi32>
    %c1_i32 = arith.constant 1 : i32
    %6 = tpu.dynamic_rotate %1 by %c1_i32 dim 1 : vector<4x16xf32>, i32 -> vector<4x16xf32>
    %cst = arith.constant 0.000000e+00 : f32
    %7 = vector.broadcast %cst : f32 to vector<4x16xf32>
    %8 = arith.select %5, %7, %6 : vector<4x16xi1>, vector<4x16xf32>
    %c15_i32 = arith.constant 15 : i32
    %9 = vector.broadcast %c15_i32 : i32 to vector<4x16xi32>
    %10 = arith.cmpi eq, %3, %9 : vector<4x16xi32>
    %c15_i32_4 = arith.constant 15 : i32
    %11 = tpu.dynamic_rotate %1 by %c15_i32_4 dim 1 : vector<4x16xf32>, i32 -> vector<4x16xf32>
    %cst_5 = arith.constant 0.000000e+00 : f32
    %12 = vector.broadcast %cst_5 : f32 to vector<4x16xf32>
    %13 = arith.select %10, %12, %11 : vector<4x16xi1>, vector<4x16xf32>
    %14 = tpu.concatenate %8, %1, %13 in 0 : vector<4x16xf32>, vector<4x16xf32>, vector<4x16xf32> -> vector<12x16xf32>
    %cst_6 = arith.constant dense<0.000000e+00> : vector<4x16xf32>
    %15 = tpu.matmul %2, %14, %cst_6 {dimension_numbers = #tpu.dot_dimension_numbers<[1], [0], [0], [1], [0, 0, 1, 1], [], []>} : vector<4x12xf32>, vector<12x16xf32>, vector<4x16xf32> -> vector<4x16xf32>
    %c0_7 = arith.constant 0 : index
    %c0_8 = arith.constant 0 : index
    %16 = vector.load %arg3[%c0_7, %c0_8] : memref<4x1xf32, #tpu.memory_space<vmem>>, vector<4x1xf32>
    %c0_9 = arith.constant 0 : index
    %c0_10 = arith.constant 0 : index
    %17 = vector.load %arg4[%c0_9, %c0_10] : memref<4x1xf32, #tpu.memory_space<vmem>>, vector<4x1xf32>
    %cst_11 = arith.constant dense<0.000000e+00> : vector<4xf32>
    %18 = vector.multi_reduction <add>, %15, %cst_11 [1] : vector<4x16xf32> to vector<4xf32>
    %19 = vector.shape_cast %18 : vector<4xf32> to vector<4x1xf32>
    %20 = arith.mulf %15, %15 : vector<4x16xf32>
    %cst_12 = arith.constant dense<0.000000e+00> : vector<4xf32>
    %21 = vector.multi_reduction <add>, %20, %cst_12 [1] : vector<4x16xf32> to vector<4xf32>
    %22 = vector.shape_cast %21 : vector<4xf32> to vector<4x1xf32>
    %cst_13 = arith.constant 6.250000e-02 : f32
    %23 = vector.broadcast %cst_13 : f32 to vector<4x1xf32>
    %24 = arith.mulf %19, %23 : vector<4x1xf32>
    %cst_14 = arith.constant 6.250000e-02 : f32
    %25 = vector.broadcast %cst_14 : f32 to vector<4x1xf32>
    %26 = arith.mulf %22, %25 : vector<4x1xf32>
    %27 = arith.mulf %24, %24 : vector<4x1xf32>
    %28 = arith.subf %26, %27 : vector<4x1xf32>
    %cst_15 = arith.constant 0.000000e+00 : f32
    %29 = vector.broadcast %cst_15 : f32 to vector<4x1xf32>
    %30 = arith.maximumf %28, %29 : vector<4x1xf32>
    %cst_16 = arith.constant 9.99999974E-6 : f32
    %31 = vector.broadcast %cst_16 : f32 to vector<4x1xf32>
    %32 = arith.addf %30, %31 : vector<4x1xf32>
    %33 = math.rsqrt %32 : vector<4x1xf32>
    %34 = arith.mulf %16, %33 : vector<4x1xf32>
    %35 = arith.mulf %24, %34 : vector<4x1xf32>
    %36 = arith.subf %17, %35 : vector<4x1xf32>
    %37 = vector.broadcast %34 : vector<4x1xf32> to vector<4x16xf32>
    %38 = arith.mulf %15, %37 : vector<4x16xf32>
    %39 = vector.broadcast %36 : vector<4x1xf32> to vector<4x16xf32>
    %40 = arith.addf %38, %39 : vector<4x16xf32>
    %cst_17 = arith.constant 0.000000e+00 : f32
    %41 = vector.broadcast %cst_17 : f32 to vector<4x16xf32>
    %42 = arith.maximumf %40, %41 : vector<4x16xf32>
    %c0_18 = arith.constant 0 : index
    %c0_19 = arith.constant 0 : index
    %43 = vector.load %arg5[%c0_18, %c0_19] : memref<4x12xf32, #tpu.memory_space<vmem>>, vector<4x12xf32>
    %44 = tpu.iota {dimensions = array<i32: 1>} : vector<4x16xi32>
    %c0_i32_20 = arith.constant 0 : i32
    %45 = vector.broadcast %c0_i32_20 : i32 to vector<4x16xi32>
    %46 = arith.cmpi eq, %44, %45 : vector<4x16xi32>
    %c1_i32_21 = arith.constant 1 : i32
    %47 = tpu.dynamic_rotate %42 by %c1_i32_21 dim 1 : vector<4x16xf32>, i32 -> vector<4x16xf32>
    %cst_22 = arith.constant 0.000000e+00 : f32
    %48 = vector.broadcast %cst_22 : f32 to vector<4x16xf32>
    %49 = arith.select %46, %48, %47 : vector<4x16xi1>, vector<4x16xf32>
    %c15_i32_23 = arith.constant 15 : i32
    %50 = vector.broadcast %c15_i32_23 : i32 to vector<4x16xi32>
    %51 = arith.cmpi eq, %44, %50 : vector<4x16xi32>
    %c15_i32_24 = arith.constant 15 : i32
    %52 = tpu.dynamic_rotate %42 by %c15_i32_24 dim 1 : vector<4x16xf32>, i32 -> vector<4x16xf32>
    %cst_25 = arith.constant 0.000000e+00 : f32
    %53 = vector.broadcast %cst_25 : f32 to vector<4x16xf32>
    %54 = arith.select %51, %53, %52 : vector<4x16xi1>, vector<4x16xf32>
    %55 = tpu.concatenate %49, %42, %54 in 0 : vector<4x16xf32>, vector<4x16xf32>, vector<4x16xf32> -> vector<12x16xf32>
    %cst_26 = arith.constant dense<0.000000e+00> : vector<4x16xf32>
    %56 = tpu.matmul %43, %55, %cst_26 {dimension_numbers = #tpu.dot_dimension_numbers<[1], [0], [0], [1], [0, 0, 1, 1], [], []>} : vector<4x12xf32>, vector<12x16xf32>, vector<4x16xf32> -> vector<4x16xf32>
    %c0_27 = arith.constant 0 : index
    %c0_28 = arith.constant 0 : index
    %57 = vector.load %arg6[%c0_27, %c0_28] : memref<4x1xf32, #tpu.memory_space<vmem>>, vector<4x1xf32>
    %c0_29 = arith.constant 0 : index
    %c0_30 = arith.constant 0 : index
    %58 = vector.load %arg7[%c0_29, %c0_30] : memref<4x1xf32, #tpu.memory_space<vmem>>, vector<4x1xf32>
    %cst_31 = arith.constant dense<0.000000e+00> : vector<4xf32>
    %59 = vector.multi_reduction <add>, %56, %cst_31 [1] : vector<4x16xf32> to vector<4xf32>
    %60 = vector.shape_cast %59 : vector<4xf32> to vector<4x1xf32>
    %61 = arith.mulf %56, %56 : vector<4x16xf32>
    %cst_32 = arith.constant dense<0.000000e+00> : vector<4xf32>
    %62 = vector.multi_reduction <add>, %61, %cst_32 [1] : vector<4x16xf32> to vector<4xf32>
    %63 = vector.shape_cast %62 : vector<4xf32> to vector<4x1xf32>
    %cst_33 = arith.constant 6.250000e-02 : f32
    %64 = vector.broadcast %cst_33 : f32 to vector<4x1xf32>
    %65 = arith.mulf %60, %64 : vector<4x1xf32>
    %cst_34 = arith.constant 6.250000e-02 : f32
    %66 = vector.broadcast %cst_34 : f32 to vector<4x1xf32>
    %67 = arith.mulf %63, %66 : vector<4x1xf32>
    %68 = arith.mulf %65, %65 : vector<4x1xf32>
    %69 = arith.subf %67, %68 : vector<4x1xf32>
    %cst_35 = arith.constant 0.000000e+00 : f32
    %70 = vector.broadcast %cst_35 : f32 to vector<4x1xf32>
    %71 = arith.maximumf %69, %70 : vector<4x1xf32>
    %cst_36 = arith.constant 9.99999974E-6 : f32
    %72 = vector.broadcast %cst_36 : f32 to vector<4x1xf32>
    %73 = arith.addf %71, %72 : vector<4x1xf32>
    %74 = math.rsqrt %73 : vector<4x1xf32>
    %75 = arith.mulf %57, %74 : vector<4x1xf32>
    %76 = arith.mulf %65, %75 : vector<4x1xf32>
    %77 = arith.subf %58, %76 : vector<4x1xf32>
    %78 = vector.broadcast %75 : vector<4x1xf32> to vector<4x16xf32>
    %79 = arith.mulf %56, %78 : vector<4x16xf32>
    %80 = vector.broadcast %77 : vector<4x1xf32> to vector<4x16xf32>
    %81 = arith.addf %79, %80 : vector<4x16xf32>
    %82 = arith.addf %1, %81 : vector<4x16xf32>
    %c0_37 = arith.constant 0 : index
    %c0_38 = arith.constant 0 : index
    %c0_39 = arith.constant 0 : index
    %83 = vector.load %arg8[%c0_37, %c0_38, %c0_39] : memref<1x4x16xf32, #tpu.memory_space<vmem>>, vector<1x4x16xf32>
    %84 = vector.shape_cast %83 : vector<1x4x16xf32> to vector<4x16xf32>
    %85 = vector.shape_cast %82 : vector<4x16xf32> to vector<1x4x16xf32>
    tpu.vector_store %arg8[%c0_37, %c0_38, %c0_39], %85 {strides = array<i32>} : memref<1x4x16xf32, #tpu.memory_space<vmem>>, vector<1x4x16xf32>,
    return
  }
  func.func @transform_0(%arg0: i32) -> (i32, i32, i32) {
    %c0_i32 = arith.constant 0 : i32
    %c0_i32_0 = arith.constant 0 : i32
    %c0_i32_1 = arith.constant 0 : i32
    return %arg0, %c0_i32, %c0_i32_0 : i32, i32, i32
  }
  func.func @transform_1(%arg0: i32) -> (i32, i32) {
    %c0_i32 = arith.constant 0 : i32
    %c0_i32_0 = arith.constant 0 : i32
    %c0_i32_1 = arith.constant 0 : i32
    return %c0_i32, %c0_i32_0 : i32, i32
  }
  func.func @transform_2(%arg0: i32) -> (i32, i32) {
    %c0_i32 = arith.constant 0 : i32
    %c0_i32_0 = arith.constant 0 : i32
    %c0_i32_1 = arith.constant 0 : i32
    return %c0_i32, %c0_i32_0 : i32, i32
  }
  func.func @transform_3(%arg0: i32) -> (i32, i32) {
    %c0_i32 = arith.constant 0 : i32
    %c0_i32_0 = arith.constant 0 : i32
    %c0_i32_1 = arith.constant 0 : i32
    return %c0_i32, %c0_i32_0 : i32, i32
  }
  func.func @transform_4(%arg0: i32) -> (i32, i32) {
    %c0_i32 = arith.constant 0 : i32
    %c0_i32_0 = arith.constant 0 : i32
    %c0_i32_1 = arith.constant 0 : i32
    return %c0_i32, %c0_i32_0 : i32, i32
  }
  func.func @transform_5(%arg0: i32) -> (i32, i32) {
    %c0_i32 = arith.constant 0 : i32
    %c0_i32_0 = arith.constant 0 : i32
    %c0_i32_1 = arith.constant 0 : i32
    return %c0_i32, %c0_i32_0 : i32, i32
  }
  func.func @transform_6(%arg0: i32) -> (i32, i32) {
    %c0_i32 = arith.constant 0 : i32
    %c0_i32_0 = arith.constant 0 : i32
    %c0_i32_1 = arith.constant 0 : i32
    return %c0_i32, %c0_i32_0 : i32, i32
  }
  func.func @transform_7(%arg0: i32) -> (i32, i32, i32) {
    %c0_i32 = arith.constant 0 : i32
    %c0_i32_0 = arith.constant 0 : i32
    %c0_i32_1 = arith.constant 0 : i32
    return %arg0, %c0_i32, %c0_i32_0 : i32, i32, i32
  }
}

</mosaic_0001>

<bundles_post_ra>
// kernel: tpu_custom_call.1
= control target key start
LH: loop header
LB: loop body
LE: loop exit
PB: predicated region body
PF: predicated region fallthrough
CT: control target
= control target key end

     0   :  { %12 = vsyncpa [#allocation3], 0  ;;  %s988_s0 = inlined_call_operand.vmem [shape: f32[2,4,16], index: 0, kind: input, shape index: {}]   ;;  %s989_s1 = inlined_call_operand.vmem [shape: f32[4,12], index: 1, kind: input, shape index: {}]   ;;  %s990_s2 = inlined_call_operand.vmem [shape: f32[4,1], index: 2, kind: input, shape index: {}]   ;;  %s991_s3 = inlined_call_operand.vmem [shape: f32[4,1], index: 3, kind: input, shape index: {}]   ;;  %s992_s4 = inlined_call_operand.vmem [shape: f32[4,12], index: 4, kind: input, shape index: {}]   ;;  %s993_s5 = inlined_call_operand.vmem [shape: f32[4,1], index: 5, kind: input, shape index: {}]   ;;  %s994_s6 = inlined_call_operand.vmem [shape: f32[4,1], index: 6, kind: input, shape index: {}]   ;;  %s995_s7 = inlined_call_operand.hbm [shape: f32[2,4,16], index: 7, kind: output, shape index: {}]  }
   0x1   :  { %14 = vsyncpa [#allocation3 + $0x1], 0  ;;  %s821_s24 = smov 0   ;;  %s823_s25 = smov 0  }
   0x2   :  { %s825_s26 = smov 0   ;;  %s827_s27 = smov 0  }
   0x3 LB: > { %s842_s28 = sadd.s32 4294967295, %s770_s27   ;;  %s613_s29 = sadd.s32 4294967294, %s770_s27   ;;  %s770_s27 = sphi %s827_s27, %s1003_s27   ;;  %s766_s26 = sphi %s825_s26, %s1002_s26   ;;  %s762_s25 = sphi %s823_s25, %s1001_s25   ;;  %s758_s24 = sphi %s821_s24, %s1000_s24  }
   0x4   : > { %s846_s30 = sadd.s32 1, %s770_s27   ;;  %s179_s8 = sadd.s32 1, %s766_s26 }
   0x5   : > { %s176_s9 = ssub.s32 %s770_s27, %s846_s30  ;;  %p189_p0 = scmp.ne.s32.totalorder %s766_s26, %s762_s25 }
   0x6   : > { %p177_p1 = scmp.eq.s32.totalorder %s176_s9, 0  ;;  %p190_p2 = scmp.eq.s32.totalorder %s842_s28, 1 }
   0x7   : > { %p195_p3 = scmp.ne.s32.totalorder %s762_s25, %s758_s24  ;;  %p196_p4 = scmp.eq.s32.totalorder %s613_s29, 1 }
   0x8   : > { %s857_s10 = scalar_select %p177_p1, %s766_s26, %s179_s8  }
   0x9   : > { %p859_p5 = por %p190_p2, %p189_p0  ;;  %p863_p6 = por %p196_p4, %p195_p3 }
   0xa   : > { %p616_p7 = scmp.ge.s32.totalorder %s770_s27, 1  ;;  %p239_p8 = scmp.lt.s32.totalorder %s770_s27, 3 }
   0xc   : > { %p240_p9 = pnand %p616_p7, %p239_p8 }
   0xd   : > { %p270_p10 = scmp.lt.s32.totalorder (!%p240_p9), %s842_s28, 1  ;;  %s772_s18 = smov (!%p240_p9), 16   ;;  %vm279_vm0 = vcmask (!%p240_p9), 1047680   ;;  %v773_v3 = vmov (!%p240_p9), 0.0|0.0   ;;  %vm774_vm1 = vmmov (!%p240_p9), 0   ;;  %v775_v4 = vmov (!%p240_p9), 0.0  }
   0xe   : > { %243 = sbr.rel (%p240_p9) target bundleno = 1782 (0x6f6), region = 48  ;;  %647 = vmatprep.subr.bf16.mxu0 (!%p240_p9), %v773_v3  ;;  %651 = vmatprep.subr.bf16.mxu1 (!%p240_p9), %v773_v3  ;;  %s776_s19 = smov (!%p240_p9), 113   ;;  %v276_v7 = vlaneseq (!%p240_p9)  ;;  %vm299_vm4 = vcmask (!%p240_p9), 1043456   ;;  %vm778_vm5 = vmmov (!%p240_p9), 1   ;;  %v275_v17 = vld [vmem:[%s989_s1] sm:$0xf] (!%p240_p9) }
   0xf   : > { %637 = vmatprep.mubr.msk.f32.mxu0 (!%p240_p9), %vm774_vm1, %v775_v4  ;;  %644 = vmatprep.mubr.msk.f32.mxu1 (!%p240_p9), %vm774_vm1, %v775_v4  ;;  %s777_s20 = smov (!%p240_p9), 127   ;;  %vm896_vm6 = vmpackc.low (!%p240_p9), %vm299_vm4, %vm778_vm5  ;;  %vm301_vm7 = vcmask (!%p240_p9), 97280   ;;  %vm380_vm8 = vcmask (!%p240_p9), 125952   ;;  %v779_v23 = vmov (!%p240_p9), 0   ;;  %v378_v32 = vld [vmem:[%s990_s2] sm:$0xf] (!%p240_p9) }
  0x10   : > { %v885_v8 = vand.u32 (!%p240_p9), 127, %v276_v7  ;;  %702 = vset.pattern.permute.xlu0 (!%p240_p9), %v779_v23  ;;  %703 = vset.pattern.permute.xlu1 (!%p240_p9), %v779_v23  ;;  %v379_v35 = vld [vmem:[%s991_s3] sm:$0xf] (!%p240_p9)  ;;  %s624_s21 = sshll.u32 (!%p240_p9), %s842_s28, 6 }
  0x11   : > { %v411_v54 = vld [vmem:[%s992_s4] sm:$0xf] (!%p240_p9)  ;;  %s945_s9 = scalar_lea.hbm (!%p240_p9), %s995_s7, %s624_s21 }
  0x12   : > { %vm278_vm2 = vcmp.eq.s32.totalorder (!%p240_p9), %v885_v8, 0  ;;  %vm291_vm3 = vcmp.eq.s32.totalorder (!%p240_p9), %v885_v8, 15  ;;  %v508_v8 = vld [vmem:[%s994_s6] sm:$0xf] (!%p240_p9) }
  0x15   : > { %s271_s13 = scalar_select %p270_p10, %s842_s28, 1 }
  0x16   : > { %s780_s28 = smov [#allocation2]  }
  0x17   : > { %s618_s14 = sshll.u32 %s271_s13, 2  ;;  %s712_s15 = sshll.u32 %s780_s28, 4  ;;  %s713_s15 = int_to_ptr.vmem [resolvable:$false] %s712_s15 }
  0x18   : > { %s273_s17 = scalar_lea.vmem %s988_s0, %s618_s14  ;;  %s714_s16 = scalar_lea.vmem %s713_s15, 128 }
  0x19   : > { %v874_v0 = vld [vmem:[%s273_s17] sm:$0xf] }
  0x1a   : > { %280 = vrot.lane.b32.xlu0 %v874_v0, %s772_s18  ;;  %v297_v10 = vrot.slane %v874_v0, 4 }
  0x8c   : > { %v281_v1 = vpop.permute.xlu0 %280 }
  0x8d   : > { %v282_v2 = vsel %vm279_vm0, %v281_v1, %v874_v0 }
  0x8e   : > { %283 = vrot.lane.b32.xlu0 %v282_v2, %s772_s18 }
 0x100   : > { %v284_v5 = vpop.permute.xlu0 %283 }
 0x101   : > { %v285_v6 = vsel %vm279_vm0, %v284_v5, %v874_v0  ;;  %v507_v5 = vld [vmem:[%s993_s5] sm:$0xf] }
 0x102   : > { %287 = vrot.lane.b32.xlu1 %v285_v6, %s776_s19 }
 0x106   : > { %292 = vrot.lane.b32.xlu1 %v285_v6, %s777_s20 }
 0x174   : > { %v288_v9 = vpop.permute.xlu1 %287 }
 0x175   : > { %v290_v11 = vsel %vm278_vm2, 0.0, %v288_v9 }
 0x176   : > { %v300_v14 = vsel %vm299_vm4, %v290_v11, %v297_v10 }
 0x178   : > { %v293_v12 = vpop.permute.xlu1 %292 }
 0x179   : > { %v295_v13 = vsel %vm291_vm3, 0.0, %v293_v12 }
 0x17a   : > { %v648_v16 = vpack.c.bf16 %v295_v13, %v300_v14 }
 0x17c   : > { %650 = vmatpush3.bf16.msk.msra.mxu0 %vm896_vm6, %v648_v16 }
 0x17f   : > { %638 = vmatmul.mubr.msk.f32.vlgmr.msra.gmra.mrb[0].mxu0 %vm301_vm7, %v275_v17 }
 0x252   : > { %v374_v18 = vpop.f32.mrb[0].mxu0 }
 0x253   : > { %v639_v19 = vpop.f32.mrb[1].mxu0  ;;  %v381_v20 = vsel %vm380_vm8, %v374_v18, 0.0  ;;  %v384_v21 = vmul.f32 %v374_v18, %v374_v18 }
 0x254   : > { %382 = vadd.xlane.f32.xlu0 %v381_v20 }
 0x255   : > { %v385_v22 = vsel %vm380_vm8, %v384_v21, 0.0 }
 0x256   : > { %386 = vadd.xlane.f32.xlu1 %v385_v22 }
 0x2e1   : > { %v383_v24 = vpop.xlane.xlu0 %382 }
 0x2e2   : > { %v388_v25 = vmul.f32 0.0625, %v383_v24 }
 0x2e3   : > { %v387_v26 = vpop.xlane.xlu1 %386 }
 0x2e4   : > { %v390_v27 = vmul.f32 %v388_v25, %v388_v25  ;;  %v389_v28 = vmul.f32 0.0625, %v387_v26 }
 0x2e6   : > { %v391_v29 = vsub.f32 %v389_v28, %v390_v27 }
 0x2e8   : > { %v392_v30 = vmax.f32 %v391_v29, 0.0 }
 0x2ea   : > { %v393_v31 = vadd.f32 1e-05, %v392_v30 }
 0x2ec   : > { %704 = vrsqrt.f32 %v393_v31 }
 0x2f6   : > { %v705_v33 = vpop.eup %704 }
 0x2f7   : > { %v395_v34 = vmul.f32 %v705_v33, %v378_v32 }
 0x2f9   : > { %400 = vperm.xlu0 %702, %v395_v34   ;;  %v396_v36 = vmul.f32 %v395_v34, %v388_v25 }
 0x2fb   : > { %v397_v37 = vsub.f32 %v379_v35, %v396_v36 }
 0x2fd   : > { %406 = vperm.xlu1 %703, %v397_v37  }
 0x378   : > { %v401_v38 = vpop.permute.xlu0 %400 }
 0x379   : > { %v403_v39 = vmul.f32 %v401_v38, %v374_v18 }
 0x37c   : > { %v407_v40 = vpop.permute.xlu1 %406 }
 0x37d   : > { %v409_v41 = vadd.f32 %v407_v40, %v403_v39 }
 0x37f   : > { %v410_v42 = vmax.f32 %v409_v41, 0.0 }
 0x381   : > { %412 = vrot.lane.b32.xlu1 %v410_v42, %s772_s18  ;;  %v428_v49 = vrot.slane %v410_v42, 4 }
 0x3f3   : > { %v413_v43 = vpop.permute.xlu1 %412 }
 0x3f4   : > { %v414_v44 = vsel %vm279_vm0, %v413_v43, %v410_v42 }
 0x3f5   : > { %415 = vrot.lane.b32.xlu1 %v414_v44, %s772_s18 }
 0x467   : > { %v416_v45 = vpop.permute.xlu1 %415 }
 0x468   : > { %v417_v46 = vsel %vm279_vm0, %v416_v45, %v410_v42 }
 0x469   : > { %419 = vrot.lane.b32.xlu1 %v417_v46, %s776_s19  ;;  %s267_s19 = sand.u32 1, %s762_s25  }
 0x46a   : > { %s541_s13 = scalar_lea.sflag [#allocation3], %s267_s19 }
 0x46d   : > { %423 = vrot.lane.b32.xlu1 %v417_v46, %s777_s20  ;;  %s617_s20 = sshll.u32 %s267_s19, 2 }
 0x46e   : > { %s269_s22 = scalar_lea.vmem [#allocation2], %s617_s20 }
 0x46f   : > { %s554_s23 = sshll.u32 %s269_s22, 4  ;;  %s947_s23 = int_to_ptr.vmem [resolvable:$true] %s554_s23 }
 0x470   : > { %s708_s14 = scalar_lea.vmem %s947_s23, 64  ;;  %p715_p0 = scmp.lt.s32.totalorder %s947_s23, %s713_s15 }
 0x471   : > { %p709_p11 = scmp.ne.s32.totalorder %s947_s23, %s708_s14  ;;  %p716_p1 = scmp.lt.s32.totalorder %s714_s16, %s708_s14 }
 0x473   : > { %p710_p12 = pnand %p709_p11, %p859_p5  ;;  %p717_p2 = por %p716_p1, %p715_p0 }
 0x475   : > { %p711_p13 = pneg %p710_p12 }
 0x477   : > { %p718_p3 = pnand %p717_p2, %p711_p13 }
 0x4db   : > { %v420_v47 = vpop.permute.xlu1 %419 }
 0x4dc   : > { %v422_v48 = vsel %vm278_vm2, 0.0, %v420_v47 }
 0x4dd   : > { %v430_v52 = vsel %vm299_vm4, %v422_v48, %v428_v49 }
 0x4df   : > { %v424_v50 = vpop.permute.xlu1 %423 }
 0x4e0   : > { %v426_v51 = vsel %vm291_vm3, 0.0, %v424_v50 }
 0x4e1   : > { %v652_v53 = vpack.c.bf16 %v426_v51, %v430_v52 }
 0x4e3   : > { %654 = vmatpush3.bf16.msk.msra.mxu1 %vm896_vm6, %v652_v53 }
 0x4e6   : > { %645 = vmatmul.mubr.msk.f32.vlgmr.msra.gmra.mrb[0].mxu1 %vm301_vm7, %v411_v54 }
 0x5b9   : > { %v503_v55 = vpop.f32.mrb[0].mxu1 }
 0x5ba   : > { %v646_v56 = vpop.f32.mrb[1].mxu1  ;;  %v509_v57 = vsel %vm380_vm8, %v503_v55, 0.0  ;;  %v512_v58 = vmul.f32 %v503_v55, %v503_v55 }
 0x5bb   : > { %510 = vadd.xlane.f32.xlu1 %v509_v57 }
 0x5bc   : > { %v513_v59 = vsel %vm380_vm8, %v512_v58, 0.0 }
 0x5bd   : > { %514 = vadd.xlane.f32.xlu0 %v513_v59 }
 0x648   : > { %v511_v60 = vpop.xlane.xlu1 %510 }
 0x649   : > { %v516_v61 = vmul.f32 0.0625, %v511_v60 }
 0x64a   : > { %v515_v62 = vpop.xlane.xlu0 %514 }
 0x64b   : > { %v518_v63 = vmul.f32 %v516_v61, %v516_v61  ;;  %v517_v1 = vmul.f32 0.0625, %v515_v62 }
 0x64d   : > { %v519_v2 = vsub.f32 %v517_v1, %v518_v63 }
 0x64f   : > { %v520_v3 = vmax.f32 %v519_v2, 0.0 }
 0x651   : > { %v521_v4 = vadd.f32 1e-05, %v520_v3 }
 0x653   : > { %706 = vrsqrt.f32 %v521_v4 }
 0x65d   : > { %v707_v6 = vpop.eup %706 }
 0x65e   : > { %v523_v7 = vmul.f32 %v707_v6, %v507_v5 }
 0x660   : > { %528 = vperm.xlu1 %703, %v523_v7   ;;  %v524_v9 = vmul.f32 %v523_v7, %v516_v61 }
 0x662   : > { %v525_v10 = vsub.f32 %v508_v8, %v524_v9 }
 0x664   : > { %534 = vperm.xlu0 %702, %v525_v10  }
 0x6df   : > { %v529_v11 = vpop.permute.xlu1 %528 }
 0x6e0   : > { %v531_v12 = vmul.f32 %v529_v11, %v503_v55 }
 0x6e3   : > { %v535_v13 = vpop.permute.xlu0 %534 }
 0x6e4   : > { %v537_v14 = vadd.f32 %v535_v13, %v531_v12 }
 0x6e6   : > { %v538_v15 = vadd.f32 %v537_v14, %v874_v0 }
 0x6e8   : > { %539 = vst.msk [vmem:[%s269_s22] sm:$0xf] %vm380_vm8, %v538_v15 }
 0x6e9   : > { %721 = shalt.err (!%p718_p3)
}
 0x6ea   : > { %s722_s17 = scalar_lea.hbm %s945_s9, 64  ;;  %s726_s20 = scalar_lea.hbm %s995_s7, 128 }
 0x6eb   : > { %p723_p4 = scmp.ne.s32.totalorder %s945_s9, %s722_s17  ;;  %p727_p9 = scmp.lt.u32.totalorder %s945_s9, %s995_s7 }
 0x6ec   : > { %p728_p10 = scmp.lt.u32.totalorder %s726_s20, %s722_s17  ;;  %p730_p12 = scmp.lt.u32.totalorder %s722_s17, %s945_s9 }
 0x6ed   : > { %p724_p7 = pnand %p723_p4, %p859_p5 }
 0x6ee   : > { %p729_p11 = por %p728_p10, %p727_p9 }
 0x6ef   : > { %p725_p8 = pneg %p724_p7 }
 0x6f0   : > { %p731_p13 = por %p730_p12, %p729_p11 }
 0x6f2   : > { %p732_p0 = pnand %p731_p13, %p725_p8 }
 0x6f4   : > { %735 = shalt.err (!%p732_p0)
}
 0x6f5   : > { %655 = dma.vmem_to_hbm [thread:$0]  (%p859_p5), %s947_s23, 64, %s945_s9, %s541_s13  }
 0x6f6 PF: > { %p661_p1 = scmp.ge.s32.totalorder %s770_s27, 2  ;;  %s566_s29 = sand.u32 1, %s758_s24  }
 0x6f7   : > { %s567_s8 = scalar_lea.sflag [#allocation3], %s566_s29 }
 0x6f8   : > { %p658_p2 = pnand %p661_p1, %p863_p6 }
 0x6fa   : > { %753 = dma.done.wait (!%p658_p2), %s567_s8, 64  }
 0x6fb   : > { %755 = vsyncadd (!%p658_p2), %s567_s8, 4294967232  ;;  %p17_p3 = scmp.ge.s32.totalorder %s846_s30, 4   ;;  %s1000_s24 = smov %s762_s25 }
 0x6fc   : > { %s1001_s25 = smov %s766_s26  ;;  %s1002_s26 = smov %s857_s10 }
 0x6fd   : > { %s1003_s27 = smov %s846_s30  ;;  %19 = sbr.rel (!%p17_p3) target bundleno = 3 (0x3), region = 83 }
 0x704   :  { %572 = vsyncpa [#allocation3], 1 }
 0x705   :  { %574 = vsyncpa [#allocation3 + $0x1], 1 }

</bundles_post_ra>
